<compile_context>
chip_gen: v7x
topology: tpu7x:2x2x1
jax: 0.10.0
libtpu: 0.0.40
codegen_flags: <defaults>
</compile_context>

<pallas_src>
import jax
import jax.numpy as jnp
from jax.experimental import pallas as pl
from jax.experimental.pallas import tpu as pltpu

_MIB = 1024 * 1024


def _discriminator_kernel(v_ref, hpl_ref, hmi_ref, b_ref, sc1_ref, sc2_ref):
    # v is the precomputed c @ W^T (f32, resident across the whole grid).
    v_b = v_ref[...][:, None, :]                        # [B, 1, F] f32
    bias = b_ref[0]                                     # scalar from SMEM
    # h stays in its storage dtype (bf16 halves HBM traffic); the multiply
    # promotes to f32 in-register, so accumulation is f32 on every generation.
    sc1 = jnp.sum(hpl_ref[...] * v_b, axis=-1) + bias   # [B, TN] f32
    sc2 = jnp.sum(hmi_ref[...] * v_b, axis=-1) + bias   # [B, TN] f32
    sc1_ref[...] = sc1.astype(sc1_ref.dtype)
    sc2_ref[...] = sc2.astype(sc2_ref.dtype)


def _round_up(x, m):
    return (x + m - 1) // m * m


def _vmem_capacity_bytes():
    try:
        return int(pltpu.get_tpu_info().vmem_capacity_bytes)
    except Exception:
        return 64 * _MIB  # conservative per-TensorCore floor (v7x)


def _plan_tiles(b, n, f, h_itemsize):
    """Pick (tile_n, padded_n, vmem_limit_bytes) with padded-VMEM accounting.

    * minor dim F pads to 128 lanes in VMEM, so a tile really occupies
      b * tn * round_up(F,128) * itemsize bytes (tn multiple of 128 covers
      sublane padding for f32 and bf16 alike);
    * 2 h inputs x 2 pipeline buffers get ~60% of the scoped limit, the rest
      covers the resident v, output double-buffers and compiler slack;
    * keep at least 2 grid steps so v7x megacore sharding of the "parallel"
      N axis has something to split, and pipelining has >1 stage.
    """
    capacity = _vmem_capacity_bytes()
    vmem_limit = min(capacity * 3 // 4, 96 * _MIB)       # explicit, with headroom

    if n <= 128:
        return n, n, vmem_limit                          # single full-extent block

    f_pad = _round_up(f, 128)
    row_bytes = b * f_pad * h_itemsize                   # padded bytes per n-row
    budget = int(vmem_limit * 0.6)
    max_tn = max(128, (budget // (4 * row_bytes)) // 128 * 128)
    max_tn = min(max_tn, max(128, (8 * _MIB // row_bytes) // 128 * 128))
    half = _round_up(pl.cdiv(n, 2), 128)                 # >= 2 grid steps
    tn = max(128, min(max_tn, half))
    n_pad = _round_up(n, tn)
    return tn, n_pad, vmem_limit


def discriminator_forward(c, h_pl, h_mi, w, bias,
                          s_bias1=None, s_bias2=None, *, block_n=None):
    B, N, F = h_pl.shape
    assert c.shape == (B, F) and h_mi.shape == (B, N, F) and w.shape == (F, F)

    # Precompute v = c @ W^T once in XLA (tiny [B,F]x[F,F] matmul); the Pallas
    # kernel then only streams h.  Keeps the FxF weight out of VMEM entirely.
    v = jnp.dot(c.astype(jnp.float32), w.astype(jnp.float32).T,
                preferred_element_type=jnp.float32)      # [B, F] f32
    bias_arr = jnp.asarray(bias, jnp.float32).reshape(1)

    h_itemsize = jnp.dtype(h_pl.dtype).itemsize
    tn, n_pad, vmem_limit = _plan_tiles(B, N, F, h_itemsize)
    if block_n is not None:
        tn = block_n
        n_pad = _round_up(N, tn)
    assert n_pad % tn == 0 and (tn == n_pad or tn % 128 == 0), (N, n_pad, tn)

    if n_pad != N:
        pad = [(0, 0), (0, n_pad - N), (0, 0)]
        h_pl = jnp.pad(h_pl, pad)
        h_mi = jnp.pad(h_mi, pad)
    grid = (n_pad // tn,)

    sc1, sc2 = pl.pallas_call(
        _discriminator_kernel,
        out_shape=(
            jax.ShapeDtypeStruct((B, n_pad), jnp.float32),
            jax.ShapeDtypeStruct((B, n_pad), jnp.float32),
        ),
        grid_spec=pltpu.PrefetchScalarGridSpec(
            num_scalar_prefetch=0,
            grid=grid,
            in_specs=[
                pl.BlockSpec((B, F), lambda n: (0, 0)),             # v (resident)
                pl.BlockSpec((B, tn, F), lambda n: (0, n, 0)),      # h_pl tile
                pl.BlockSpec((B, tn, F), lambda n: (0, n, 0)),      # h_mi tile
                pl.BlockSpec(memory_space=pltpu.MemorySpace.SMEM),  # bias scalar
            ],
            out_specs=(
                pl.BlockSpec((B, tn), lambda n: (0, n)),
                pl.BlockSpec((B, tn), lambda n: (0, n)),
            ),
        ),
        compiler_params=pltpu.CompilerParams(
            dimension_semantics=("parallel",),
            vmem_limit_bytes=vmem_limit,
        ),
    )(v, h_pl, h_mi, bias_arr)

    if n_pad != N:
        sc1 = sc1[:, :N]
        sc2 = sc2[:, :N]
    # Optional additive score biases (plain-JAX glue, matches PyTorch semantics).
    if s_bias1 is not None:
        sc1 = sc1 + s_bias1
    if s_bias2 is not None:
        sc2 = sc2 + s_bias2
    return jnp.concatenate([sc1, sc2], axis=1)


def init_bilinear_params(key, n_h):
    # xavier_uniform_ on weight of shape (1, n_h, n_h):
    #   fan_in = n_h * n_h, fan_out = 1 * n_h -> bound = sqrt(6/(fan_in+fan_out))
    fan_in, fan_out = n_h * n_h, n_h
    bound = (6.0 / (fan_in + fan_out)) ** 0.5
    w = jax.random.uniform(key, (n_h, n_h), jnp.float32, -bound, bound)
    b = jnp.zeros((), jnp.float32)
    return w, b


def _reference(c, h_pl, h_mi, w, bias, s_bias1=None, s_bias2=None):
    v = c.astype(jnp.float32) @ w.astype(jnp.float32).T
    sc1 = jnp.einsum("bnf,bf->bn", h_pl.astype(jnp.float32), v) + bias
    sc2 = jnp.einsum("bnf,bf->bn", h_mi.astype(jnp.float32), v) + bias
    if s_bias1 is not None:
        sc1 = sc1 + s_bias1
    if s_bias2 is not None:
        sc2 = sc2 + s_bias2
    return jnp.concatenate([sc1, sc2], axis=1)


if __name__ == "__main__":
    key = jax.random.PRNGKey(0)

    # --- test 1: toy module shapes (single full-extent block) --------------
    B, N, F = 2, 8, 32
    k_w, k_c, k_pl, k_mi, key = jax.random.split(key, 5)
    w, bias = init_bilinear_params(k_w, F)
    c = jax.random.normal(k_c, (B, F), jnp.float32)
    h_pl = jax.random.normal(k_pl, (B, N, F), jnp.float32)
    h_mi = jax.random.normal(k_mi, (B, N, F), jnp.float32)

    logits = jax.block_until_ready(discriminator_forward(c, h_pl, h_mi, w, bias))
    ref = _reference(c, h_pl, h_mi, w, bias)
    assert logits.shape == (B, 2 * N)
    assert jnp.allclose(logits, ref, atol=1e-4, rtol=1e-4)

    # --- test 2: tiled/pipelined path (grid > 1) + s_bias -------------------
    B2, N2, F2 = 2, 256, 32
    k_w2, k_c2, k_pl2, k_mi2, k_b1, k_b2, key = jax.random.split(key, 7)
    w2, bias2 = init_bilinear_params(k_w2, F2)
    c2 = jax.random.normal(k_c2, (B2, F2), jnp.float32)
    h_pl2 = jax.random.normal(k_pl2, (B2, N2, F2), jnp.float32)
    h_mi2 = jax.random.normal(k_mi2, (B2, N2, F2), jnp.float32)
    sb1 = jax.random.normal(k_b1, (B2, N2), jnp.float32)
    sb2 = jax.random.normal(k_b2, (B2, N2), jnp.float32)

    logits2 = jax.block_until_ready(
        discriminator_forward(c2, h_pl2, h_mi2, w2, bias2, sb1, sb2, block_n=128))
    ref2 = _reference(c2, h_pl2, h_mi2, w2, bias2, sb1, sb2)
    assert logits2.shape == (B2, 2 * N2)
    assert jnp.allclose(logits2, ref2, atol=1e-4, rtol=1e-4)

    # --- test 3: awkward N (wrapper padding path, auto tile plan) -----------
    B3, N3, F3 = 2, 200, 32
    k_w3, k_c3, k_pl3, k_mi3, key = jax.random.split(key, 5)
    w3, bias3 = init_bilinear_params(k_w3, F3)
    c3 = jax.random.normal(k_c3, (B3, F3), jnp.float32)
    h_pl3 = jax.random.normal(k_pl3, (B3, N3, F3), jnp.float32)
    h_mi3 = jax.random.normal(k_mi3, (B3, N3, F3), jnp.float32)

    logits3 = jax.block_until_ready(discriminator_forward(c3, h_pl3, h_mi3, w3, bias3))
    ref3 = _reference(c3, h_pl3, h_mi3, w3, bias3)
    assert logits3.shape == (B3, 2 * N3)
    assert jnp.allclose(logits3, ref3, atol=1e-4, rtol=1e-4)

    # --- test 4: bf16 h (halves HBM traffic; f32 accumulation in-kernel) ----
    h_pl_bf = h_pl2.astype(jnp.bfloat16)
    h_mi_bf = h_mi2.astype(jnp.bfloat16)
    logits4 = jax.block_until_ready(
        discriminator_forward(c2, h_pl_bf, h_mi_bf, w2, bias2))
    ref4 = _reference(c2, h_pl_bf, h_mi_bf, w2, bias2)
    assert jnp.allclose(logits4, ref4, atol=1e-3, rtol=1e-3)

    print("KERNEL_OK")
</pallas_src>

<mosaic_0001>
module attributes {stable_mosaic.version = 11 : i64} {
  func.func @_discriminator_kernel(%arg0: i32, %arg1: memref<2x32xf32, #tpu.memory_space<vmem>>, %arg2: memref<2x8x32xf32, #tpu.memory_space<vmem>>, %arg3: memref<2x8x32xf32, #tpu.memory_space<vmem>>, %arg4: memref<1xf32, #tpu.memory_space<smem>>, %arg5: memref<2x8xf32, #tpu.memory_space<vmem>>, %arg6: memref<2x8xf32, #tpu.memory_space<vmem>>) attributes {dimension_semantics = [#tpu.dimension_semantics<parallel>], iteration_bounds = array<i64: 1>, scalar_prefetch = 0 : i64, scratch_operands = 0 : i64, tpu.core_type = #tpu.core_type<tc>, window_params = [{pipeline_mode = #tpu.pipeline_mode<synchronous>, transform_indices = @transform_0, window_bounds = array<i64: 2, 32>}, {transform_indices = @transform_1, window_bounds = array<i64: 2, 8, 32>}, {transform_indices = @transform_2, window_bounds = array<i64: 2, 8, 32>}, {transform_indices = @transform_3, window_bounds = array<i64: 1>}, {transform_indices = @transform_4, window_bounds = array<i64: 2, 8>}, {transform_indices = @transform_5, window_bounds = array<i64: 2, 8>}]} {
    %c0 = arith.constant 0 : index
    %c0_0 = arith.constant 0 : index
    %0 = vector.load %arg1[%c0, %c0_0] : memref<2x32xf32, #tpu.memory_space<vmem>>, vector<2x32xf32>
    %1 = vector.shape_cast %0 : vector<2x32xf32> to vector<2x1x32xf32>
    %c0_1 = arith.constant 0 : index
    %2 = memref.load %arg4[%c0_1] : memref<1xf32, #tpu.memory_space<smem>>
    %c0_2 = arith.constant 0 : index
    %c0_3 = arith.constant 0 : index
    %c0_4 = arith.constant 0 : index
    %3 = vector.load %arg2[%c0_2, %c0_3, %c0_4] : memref<2x8x32xf32, #tpu.memory_space<vmem>>, vector<2x8x32xf32>
    %4 = vector.broadcast %1 : vector<2x1x32xf32> to vector<2x8x32xf32>
    %5 = arith.mulf %3, %4 : vector<2x8x32xf32>
    %cst = arith.constant dense<0.000000e+00> : vector<2x8xf32>
    %6 = vector.multi_reduction <add>, %5, %cst [2] : vector<2x8x32xf32> to vector<2x8xf32>
    %7 = vector.broadcast %2 : f32 to vector<2x8xf32>
    %8 = arith.addf %6, %7 : vector<2x8xf32>
    %c0_5 = arith.constant 0 : index
    %c0_6 = arith.constant 0 : index
    %c0_7 = arith.constant 0 : index
    %9 = vector.load %arg3[%c0_5, %c0_6, %c0_7] : memref<2x8x32xf32, #tpu.memory_space<vmem>>, vector<2x8x32xf32>
    %10 = vector.broadcast %1 : vector<2x1x32xf32> to vector<2x8x32xf32>
    %11 = arith.mulf %9, %10 : vector<2x8x32xf32>
    %cst_8 = arith.constant dense<0.000000e+00> : vector<2x8xf32>
    %12 = vector.multi_reduction <add>, %11, %cst_8 [2] : vector<2x8x32xf32> to vector<2x8xf32>
    %13 = vector.broadcast %2 : f32 to vector<2x8xf32>
    %14 = arith.addf %12, %13 : vector<2x8xf32>
    %c0_9 = arith.constant 0 : index
    %c0_10 = arith.constant 0 : index
    %15 = vector.load %arg5[%c0_9, %c0_10] : memref<2x8xf32, #tpu.memory_space<vmem>>, vector<2x8xf32>
    tpu.vector_store %arg5[%c0_9, %c0_10], %8 {strides = array<i32>} : memref<2x8xf32, #tpu.memory_space<vmem>>, vector<2x8xf32>,
    %c0_11 = arith.constant 0 : index
    %c0_12 = arith.constant 0 : index
    %16 = vector.load %arg6[%c0_11, %c0_12] : memref<2x8xf32, #tpu.memory_space<vmem>>, vector<2x8xf32>
    tpu.vector_store %arg6[%c0_11, %c0_12], %14 {strides = array<i32>} : memref<2x8xf32, #tpu.memory_space<vmem>>, vector<2x8xf32>,
    return
  }
  func.func @transform_0(%arg0: i32) -> (i32, i32) {
    %c0_i32 = arith.constant 0 : i32
    %c0_i32_0 = arith.constant 0 : i32
    %c0_i32_1 = arith.constant 0 : i32
    return %c0_i32, %c0_i32_0 : i32, i32
  }
  func.func @transform_1(%arg0: i32) -> (i32, i32, i32) {
    %c0_i32 = arith.constant 0 : i32
    %c0_i32_0 = arith.constant 0 : i32
    %c0_i32_1 = arith.constant 0 : i32
    return %c0_i32, %arg0, %c0_i32_0 : i32, i32, i32
  }
  func.func @transform_2(%arg0: i32) -> (i32, i32, i32) {
    %c0_i32 = arith.constant 0 : i32
    %c0_i32_0 = arith.constant 0 : i32
    %c0_i32_1 = arith.constant 0 : i32
    return %c0_i32, %arg0, %c0_i32_0 : i32, i32, i32
  }
  func.func @transform_3(%arg0: i32) -> i32 {
    %c0_i32 = arith.constant 0 : i32
    %c0_i32_0 = arith.constant 0 : i32
    return %c0_i32 : i32
  }
  func.func @transform_4(%arg0: i32) -> (i32, i32) {
    %c0_i32 = arith.constant 0 : i32
    %c0_i32_0 = arith.constant 0 : i32
    return %c0_i32, %arg0 : i32, i32
  }
  func.func @transform_5(%arg0: i32) -> (i32, i32) {
    %c0_i32 = arith.constant 0 : i32
    %c0_i32_0 = arith.constant 0 : i32
    return %c0_i32, %arg0 : i32, i32
  }
}

</mosaic_0001>

<bundles_post_ra>
// kernel: tpu_custom_call.1
= control target key start
LH: loop header
LB: loop body
LE: loop exit
PB: predicated region body
PF: predicated region fallthrough
CT: control target
= control target key end

     0   :  { %12 = vsyncpa [#allocation4], 0  ;;  %s366_s0 = inlined_call_operand.vmem [shape: f32[2,32], index: 0, kind: input, shape index: {}]   ;;  %s367_s1 = inlined_call_operand.hbm [shape: f32[2,8,32], index: 1, kind: input, shape index: {}]   ;;  %s368_s2 = inlined_call_operand.hbm [shape: f32[2,8,32], index: 2, kind: input, shape index: {}]   ;;  %s369_s3 = inlined_call_operand.<no memory space> [shape: f32[1], index: 3, kind: input, shape index: {}]   ;;  %s370_s4 = inlined_call_operand.hbm [shape: f32[2,8], index: 4, kind: output, shape index: {0}]   ;;  %s371_s5 = inlined_call_operand.hbm [shape: f32[2,8], index: 5, kind: output, shape index: {1}]  }
   0x1   :  { %13 = vsyncpa [#allocation7], 0 }
   0x2   :  { %14 = vsyncpa [#allocation5], 0 }
   0x3   :  { %15 = vsyncpa [#allocation10], 0  ;;  %s275_s18 = smov [#allocation3]   ;;  %s179_s22 = scalar_lea.hbm %s367_s1, 256 }
   0x4   :  { %s23_s19 = sshll.u32 %s275_s18, 4  ;;  %p180_p0 = scmp.ne.s32.totalorder %s367_s1, %s179_s22  ;;  %s24_s19 = int_to_ptr.vmem [resolvable:$true] %s23_s19 }
   0x5   :  { %p183_p1 = scmp.lt.u32.totalorder %s179_s22, %s367_s1 }
   0x7   :  { %p185_p2 = pnand %p183_p1, %p180_p0 }
   0x9   :  { %188 = shalt.err (!%p185_p2)
}
   0xa   :  { %s189_s27 = scalar_lea.vmem %s24_s19, 256  ;;  %p194_p4 = scmp.lt.s32.totalorder %s24_s19, %s24_s19 }
   0xb   :  { %p190_p3 = scmp.ne.s32.totalorder %s24_s19, %s189_s27  ;;  %p195_p5 = scmp.lt.s32.totalorder %s189_s27, %s189_s27 }
   0xd   :  { %p196_p6 = por %p195_p5, %p194_p4 }
   0xf   :  { %p197_p7 = pnand %p196_p6, %p190_p3 }
  0x11   :  { %200 = shalt.err (!%p197_p7)
}
  0x12   :  { %s276_s28 = smov 128   ;;  %s277_s29 = smov 8  }
  0x13   :  { %29 = dma.hbm_to_vmem [thread:$0]  %s367_s1, 256, %s24_s19, [#allocation4], %s276_s28, %s276_s28, %s277_s29  }
  0x14   :  { %s278_s7 = smov [#allocation6]   ;;  %s201_s11 = scalar_lea.hbm %s368_s2, 256 }
  0x15   :  { %s35_s8 = sshll.u32 %s278_s7, 4  ;;  %p202_p8 = scmp.ne.s32.totalorder %s368_s2, %s201_s11  ;;  %s36_s8 = int_to_ptr.vmem [resolvable:$true] %s35_s8 }
  0x16   :  { %p205_p9 = scmp.lt.u32.totalorder %s201_s11, %s368_s2 }
  0x18   :  { %p207_p10 = pnand %p205_p9, %p202_p8 }
  0x1a   :  { %210 = shalt.err (!%p207_p10)
}
  0x1b   :  { %s211_s16 = scalar_lea.vmem %s36_s8, 256  ;;  %p216_p12 = scmp.lt.s32.totalorder %s36_s8, %s36_s8 }
  0x1c   :  { %p212_p11 = scmp.ne.s32.totalorder %s36_s8, %s211_s16  ;;  %p217_p13 = scmp.lt.s32.totalorder %s211_s16, %s211_s16 }
  0x1e   :  { %p218_p0 = por %p217_p13, %p216_p12 }
  0x20   :  { %p219_p1 = pnand %p218_p0, %p212_p11 }
  0x22   :  { %222 = shalt.err (!%p219_p1)
}
  0x23   :  { %41 = dma.hbm_to_vmem [thread:$0]  %s368_s2, 256, %s36_s8, [#allocation7], %s276_s28, %s276_s28, %s277_s29  }
  0x24   :  { %267 = dma.done.wait [#allocation4], 256  }
  0x25   :  { %268 = vsyncadd [#allocation4], 4294967040 }
  0x26   :  { %269 = dma.done.wait [#allocation7], 256  }
  0x27   :  { %270 = vsyncadd [#allocation7], 4294967040  ;;  %v63_v0 = vlaneseq  ;;  %v279_v1 = vmov 1966171168   ;;  %v99_v12 = vld [vmem:[#allocation6] sm:$0xff]  ;;  %v75_v13 = vld [vmem:[#allocation3] sm:$0xff]  ;;  %v96_v27 = vstv %s369_s3 }
  0x28   :  { %v61_v2 = vunpack.c.l.s4 %v279_v1  ;;  %v171_v9 = vld.sshfl [vmem:[%s366_s0] sm:$0x11 pattern:$0x75316420]  ;;  %vm89_vm0 = vcmask 261120   ;;  %v100_v16 = vld [vmem:[#allocation6 + $0x8] sm:$0xff] }
  0x29   :  { %v64_v3 = vshrl.u32 %v63_v0, 7  ;;  %v114_v4 = vand.u32 127, %v63_v0  ;;  %v59_v11 = vcombine.high %v171_v9, %v171_v9  ;;  %v76_v17 = vld [vmem:[#allocation3 + $0x8] sm:$0xff]  ;;  %s280_s20 = smov [#allocation8]   ;;  %vm123_vm1 = vcmask 1041409   ;;  %s281_s22 = smov [#allocation9]  }
  0x2a   :  { %v62_v5 = vunpack.c.0.s8 %v61_v2  ;;  %s147_s21 = sshll.u32 %s280_s20, 4  ;;  %vm126_vm2 = vcmask 58368   ;;  %s157_s23 = sshll.u32 %s281_s22, 4  ;;  %s148_s21 = int_to_ptr.vmem [resolvable:$true] %s147_s21  ;;  %s158_s23 = int_to_ptr.vmem [resolvable:$true] %s157_s23 }
  0x2b   :  { %v117_v6 = vsub.s32 %v114_v4, %v64_v3  ;;  %v79_v8 = vsub.s32 0, %v64_v3  ;;  %s223_s3 = scalar_lea.vmem %s148_s21, 32  ;;  %p228_p3 = scmp.lt.s32.totalorder %s148_s21, %s148_s21 }
  0x2c   :  { %v65_v7 = vsub.s32 %v62_v5, %v64_v3  ;;  %p224_p2 = scmp.ne.s32.totalorder %s148_s21, %s223_s3  ;;  %p229_p4 = scmp.lt.s32.totalorder %s223_s3, %s223_s3 }
  0x2e   :  { %v66_v10 = vrot.slane %v171_v9, %v65_v7  ;;  %v73_v15 = vrot.slane %v59_v11, %v65_v7  ;;  %p230_p5 = por %p229_p4, %p228_p3 }
  0x30   :  { %v80_v14 = vrot.slane %v66_v10, %v79_v8  ;;  %v84_v20 = vrot.slane %v73_v15, %v79_v8  ;;  %p231_p6 = pnand %p230_p5, %p224_p2 }
  0x32   :  { %v101_v18 = vmul.f32 %v99_v12, %v80_v14  ;;  %v87_v19 = vmul.f32 %v80_v14, %v75_v13  ;;  %v102_v23 = vmul.f32 %v100_v16, %v84_v20  ;;  %v88_v24 = vmul.f32 %v84_v20, %v76_v17 }
  0x34   :  { %v103_v21 = vsel %vm89_vm0, %v101_v18, 0.0  ;;  %v90_v22 = vsel %vm89_vm0, %v87_v19, 0.0  ;;  %v106_v25 = vsel %vm89_vm0, %v102_v23, 0.0  ;;  %v93_v26 = vsel %vm89_vm0, %v88_v24, 0.0 }
  0x35   :  { %104 = vadd.xlane.f32.xlu1 %v103_v21  ;;  %91 = vadd.xlane.f32.xlu0 %v90_v22 }
  0x39   :  { %107 = vadd.xlane.f32.xlu1 %v106_v25  ;;  %94 = vadd.xlane.f32.xlu0 %v93_v26 }
  0xc2   :  { %v105_v28 = vpop.xlane.xlu1 %104  ;;  %v92_v29 = vpop.xlane.xlu0 %91 }
  0xc3   :  { %v109_v30 = vadd.f32 %v105_v28, %v96_v27  ;;  %v97_v31 = vadd.f32 %v96_v27, %v92_v29 }
  0xc5   :  { %v133_v36 = vrot.slane %v109_v30, %v117_v6  ;;  %v118_v37 = vrot.slane %v97_v31, %v117_v6 }
  0xc6   :  { %v108_v32 = vpop.xlane.xlu1 %107  ;;  %v95_v33 = vpop.xlane.xlu0 %94 }
  0xc7   :  { %v110_v34 = vadd.f32 %v108_v32, %v96_v27  ;;  %v98_v35 = vadd.f32 %v96_v27, %v95_v33 }
  0xc9   :  { %v137_v38 = vrot.slane %v110_v34, %v117_v6  ;;  %v122_v39 = vrot.slane %v98_v35, %v117_v6 }
  0xcb   :  { %v124_v40 = vsel %vm123_vm1, %v122_v39, %v118_v37  ;;  %v138_v41 = vsel %vm123_vm1, %v137_v38, %v133_v36 }
  0xcc   :  { %127 = vst.msk [vmem:[#allocation8] sm:$0x3] %vm126_vm2, %v124_v40  ;;  %140 = vst.msk [vmem:[#allocation9] sm:$0x3] %vm126_vm2, %v138_v41 }
  0xcd   :  { %234 = shalt.err (!%p231_p6)
}
  0xce   :  { %s235_s26 = scalar_lea.hbm %s370_s4, 32 }
  0xcf   :  { %p236_p7 = scmp.ne.s32.totalorder %s370_s4, %s235_s26  ;;  %p239_p8 = scmp.lt.u32.totalorder %s235_s26, %s370_s4 }
  0xd1   :  { %p241_p9 = pnand %p239_p8, %p236_p7 }
  0xd3   :  { %244 = shalt.err (!%p241_p9)
}
  0xd4   :  { %150 = dma.vmem_to_hbm [thread:$0]  %s148_s21, 32, %s370_s4, [#allocation5]  }
  0xd5   :  { %s245_s8 = scalar_lea.vmem %s158_s23, 32  ;;  %p250_p11 = scmp.lt.s32.totalorder %s158_s23, %s158_s23 }
  0xd6   :  { %p246_p10 = scmp.ne.s32.totalorder %s158_s23, %s245_s8  ;;  %p251_p12 = scmp.lt.s32.totalorder %s245_s8, %s245_s8 }
  0xd8   :  { %p252_p13 = por %p251_p12, %p250_p11 }
  0xda   :  { %p253_p0 = pnand %p252_p13, %p246_p10 }
  0xdc   :  { %256 = shalt.err (!%p253_p0)
}
  0xdd   :  { %s257_s11 = scalar_lea.hbm %s371_s5, 32 }
  0xde   :  { %p258_p1 = scmp.ne.s32.totalorder %s371_s5, %s257_s11  ;;  %p261_p2 = scmp.lt.u32.totalorder %s257_s11, %s371_s5 }
  0xe0   :  { %p263_p3 = pnand %p261_p2, %p258_p1 }
  0xe2   :  { %266 = shalt.err (!%p263_p3)
}
  0xe3   :  { %160 = dma.vmem_to_hbm [thread:$0]  %s158_s23, 32, %s371_s5, [#allocation10]  }
  0xe4   :  { %271 = dma.done.wait [#allocation5], 32  }
  0xe5   :  { %272 = vsyncadd [#allocation5], 4294967264 }
  0xe6   :  { %273 = dma.done.wait [#allocation10], 32  }
  0xe7   :  { %274 = vsyncadd [#allocation10], 4294967264 }
  0xe8   :  { %167 = vsyncpa [#allocation4], 1 }
  0xe9   :  { %168 = vsyncpa [#allocation7], 1 }
  0xea   :  { %169 = vsyncpa [#allocation5], 1 }
  0xeb   :  { %170 = vsyncpa [#allocation10], 1 }

</bundles_post_ra>
